<compile_context>
chip_gen: v7x
topology: tpu7x:2x2x1
jax: 0.10.0
libtpu: 0.0.40
codegen_flags: <defaults>
</compile_context>

<pallas_src>
import functools

import jax
import jax.numpy as jnp
import numpy as np
from jax.experimental import pallas as pl
from jax.experimental.pallas import tpu as pltpu


# ----------------------------------------------------------------------------
# Helpers
# ----------------------------------------------------------------------------
def _tile_mult(n, cap, mult):
    """Largest divisor of n that is a multiple of `mult` and <= cap, else n.

    Satisfies the (8, 128) BlockSpec constraint: the returned tile is either
    a multiple of `mult` or the full dimension."""
    for t in range(min(n, cap), mult - 1, -1):
        if n % t == 0 and t % mult == 0:
            return t
    return n


def _derive_vmem_limit():
    """Generation-aware VMEM budget: ~75% of physical capacity.

    v5e/v6e have 128 MiB per core, v7x only 64 MiB; the 25% headroom covers
    Mosaic internal scratch so we never request more than physically exists."""
    cap = 64 * 1024 * 1024  # conservative fallback (v7x physical size)
    try:
        info = pltpu.get_tpu_info()
        cap = int(getattr(info, "vmem_capacity_bytes", cap)) or cap
    except Exception:
        pass
    return (cap // 4) * 3


# ----------------------------------------------------------------------------
# Kernel 1: fused QKV projection (contraction-tiled, bf16 MXU operands)
# ----------------------------------------------------------------------------
def _qkv_proj_kernel(x_ref, w_ref, b_ref, q_ref, k_ref, v_ref, acc_ref, *,
                     embed_dim):
    ki = pl.program_id(2)

    @pl.when(ki == 0)
    def _init():
        acc_ref[...] = jnp.zeros_like(acc_ref)

    # bf16 operands for the MXU, f32 accumulation.
    x = x_ref[0].astype(jnp.bfloat16)                                   # [ts, tk]
    acc_ref[...] += jnp.dot(x, w_ref[...], preferred_element_type=jnp.float32)

    @pl.when(ki == pl.num_programs(2) - 1)
    def _finalize():
        y = acc_ref[...] + b_ref[...]                                   # [ts, 3E] f32
        q_ref[0] = y[:, :embed_dim].astype(q_ref.dtype)
        k_ref[0] = y[:, embed_dim:2 * embed_dim].astype(k_ref.dtype)
        v_ref[0] = y[:, 2 * embed_dim:].astype(v_ref.dtype)


# ----------------------------------------------------------------------------
# Kernel 2: banded local attention with exp(0) out-of-window correction
# ----------------------------------------------------------------------------
def _attn_kernel(q_ref, k_ref, v_ref, vsum_ref, o_ref, m_ref, l_ref, acc_ref, *,
                 num_heads, tq, seq_len, window_size, n_side, scale):
    qi = pl.program_id(1)
    t = pl.program_id(2)
    nq = pl.num_programs(1)
    n_kv = pl.num_programs(2)

    @pl.when(t == 0)
    def _init():
        # m starts at 0: the analytic zero-column correction below is exact
        # for ANY m, and m >= 0 keeps every exp() argument <= 0 (no overflow).
        m_ref[...] = jnp.zeros_like(m_ref)
        l_ref[...] = jnp.zeros_like(l_ref)
        acc_ref[...] = jnp.zeros_like(acc_ref)

    kv_block = qi - n_side + t                 # intended (unclamped) kv block
    valid = (kv_block >= 0) & (kv_block < nq)

    # Fully out-of-range (clamped duplicate) edge steps contribute p == 0
    # everywhere: skip all MXU / EUP work for them (DMA still happens).
    @pl.when(valid)
    def _update():
        row0 = qi * tq
        col0 = kv_block * tq
        rows = jax.lax.broadcasted_iota(jnp.int32, (tq, tq), 0) + row0
        cols = jax.lax.broadcasted_iota(jnp.int32, (tq, tq), 1) + col0
        # Reference window for row i is [i - W, i + W) (end exclusive); valid
        # blocks already keep cols inside [0, S).
        in_win = (cols >= rows - window_size) & (cols < rows + window_size)

        q = q_ref[0]                                                    # [H, tq, D]  bf16
        k = k_ref[0]                                                    # [H, tkv, D] bf16
        v = v_ref[0]                                                    # [H, tkv, D] bf16
        # Batched-over-heads QK^T on the MXU (bf16 operands, f32 accumulation).
        s = jnp.einsum("hqd,hkd->hqk", q, k,
                       preferred_element_type=jnp.float32) * scale      # [H, tq, tkv]
        blk_max = jnp.max(jnp.where(in_win[None], s, -jnp.inf),
                          axis=-1, keepdims=True)                       # [H, tq, 1]
        m_prev = m_ref[...]
        m_new = jnp.maximum(m_prev, blk_max)
        alpha = jnp.exp(m_prev - m_new)
        # (e^{s-m} - e^{-m}) inside the window, 0 outside; the e^{-m} "floor"
        # of every column (softmax weight of a 0-score column) is re-added
        # analytically in the finalize step via the V column-sum.
        p = jnp.where(in_win[None], jnp.exp(s - m_new) - jnp.exp(-m_new), 0.0)
        l_ref[...] = alpha * l_ref[...] + jnp.sum(p, axis=-1, keepdims=True)
        acc_ref[...] = alpha * acc_ref[...] + jnp.einsum(
            "hqk,hkd->hqd", p.astype(v.dtype), v,
            preferred_element_type=jnp.float32)
        m_ref[...] = m_new

    @pl.when(t == n_kv - 1)
    def _finalize():
        m = m_ref[...]                              # [H, tq, 1]
        e0 = jnp.exp(-m)                            # weight of a 0-score column
        num = acc_ref[...] + e0 * vsum_ref[0]       # [H, tq, D]
        den = l_ref[...] + jnp.float32(seq_len) * e0
        out4 = num * (1.0 / den)                    # exact f32 divide on [H, tq, 1]
        # Head h occupies columns [h*D, (h+1)*D) of the (B, S, E) output, so the
        # reference's transpose(1,2).view(B,S,E) costs no extra HBM pass.  One
        # lane-dense [tq, E] store instead of H masked D-wide partial stores.
        o_ref[0] = jnp.concatenate(
            [out4[h] for h in range(num_heads)], axis=-1).astype(o_ref.dtype)


# ----------------------------------------------------------------------------
# Wrapper
# ----------------------------------------------------------------------------
def local_attention(x, params, num_heads, window_size):
    B, S, E = x.shape
    assert E % num_heads == 0
    D = E // num_heads
    scale = D ** (-0.5)

    vmem_limit = _derive_vmem_limit()
    big_vmem = vmem_limit >= 72 * 1024 * 1024      # v5e / v6e class budgets

    # PyTorch Linear: y = x @ W.T + b (W is [out, in]); concatenate the three
    # transposed weights (bf16 MXU operand) so kernel 1 does one wide matmul.
    wqkv = jnp.concatenate(
        [params["wq"].T, params["wk"].T, params["wv"].T],
        axis=1).astype(jnp.bfloat16)                                    # [E, 3E]
    bqkv = jnp.concatenate(
        [params["bq"], params["bk"], params["bv"]]
    ).reshape(1, 3 * E).astype(jnp.float32)                             # [1, 3E]

    # --- Kernel 1: fused QKV projection, grid (batch, seq tiles, E tiles) ---
    ts = _tile_mult(S, 512 if big_vmem else 256, 8)
    tk = _tile_mult(E, 512, 128)   # contraction tile keeps the (tk, 3E) weight
                                   # block small enough for v7x's 64 MiB VMEM
    ns, nk = S // ts, E // tk
    # TODO(synk): for E large enough that the (ts, 3E) f32 accumulator itself
    # no longer fits, additionally tile the 3E output dimension.
    proj_cost = pl.CostEstimate(
        flops=2 * B * S * E * 3 * E,
        transcendentals=0,
        bytes_accessed=4 * B * S * E + 2 * 3 * E * E + 2 * 3 * B * S * E + 4 * 3 * E)
    q, k, v = pl.pallas_call(
        functools.partial(_qkv_proj_kernel, embed_dim=E),
        out_shape=(jax.ShapeDtypeStruct((B, S, E), jnp.bfloat16),) * 3,
        grid=(B, ns, nk),
        in_specs=[pl.BlockSpec((1, ts, tk), lambda b, si, ki: (b, si, ki)),
                  pl.BlockSpec((tk, 3 * E), lambda b, si, ki: (ki, 0)),
                  pl.BlockSpec((1, 3 * E), lambda b, si, ki: (0, 0))],
        out_specs=(pl.BlockSpec((1, ts, E), lambda b, si, ki: (b, si, 0)),) * 3,
        scratch_shapes=[pltpu.VMEM((ts, 3 * E), jnp.float32)],
        compiler_params=pltpu.CompilerParams(
            dimension_semantics=("parallel", "parallel", "arbitrary"),
            vmem_limit_bytes=vmem_limit),
        cost_estimate=proj_cost,
    )(x, wqkv, bqkv)

    # Reference does `.view(B, H, S, D)` WITHOUT a transpose: plain reshape.
    q4 = q.reshape(B, num_heads, S, D)
    k4 = k.reshape(B, num_heads, S, D)
    v4 = v.reshape(B, num_heads, S, D)
    # Per-(b, h) column-sum of V: analytic contribution of every out-of-window
    # (score == 0) position to the softmax numerator/denominator.
    # TODO(synk): fold this reduction into kernel 1 to save one HBM pass over V;
    # awkward there because the no-transpose reshape scatters each head's rows
    # across seq tiles unless ts is a multiple of S/H.
    vsum = jnp.sum(v4.astype(jnp.float32), axis=2, keepdims=True)       # (B, H, 1, D)

    # --- Kernel 2: banded local attention, grid (B, q-tiles, band steps) ---
    # Tie tq to the window: for small windows a smaller q-tile wastes far fewer
    # masked columns (the band visits (2*ceil(W/tq)+1)*tq columns per row).
    q_cap = 128 if window_size <= 128 else 256
    tq = _tile_mult(S, q_cap, 8)
    nq = S // tq
    # kv blocks needed on each side, clamped so the band never exceeds the
    # whole sequence (avoids fully-masked duplicate steps for huge windows).
    n_side = min(-(-window_size // tq), nq - 1)
    n_kv = 2 * n_side + 1

    def _kv_map(b, qi, t):
        # Only kv blocks intersecting the window band are fetched; out-of-range
        # steps are clamped (their compute is skipped in-kernel).
        return (b, 0, jnp.clip(qi - n_side + t, 0, nq - 1), 0)

    attn_cost = pl.CostEstimate(
        flops=4 * B * num_heads * S * n_kv * tq * D,
        transcendentals=2 * B * num_heads * S * n_kv * tq,
        bytes_accessed=2 * B * S * E * (1 + 2 * n_kv) + 4 * B * S * E + 4 * B * E)

    # TODO(synk): on v5e consider pipeline_mode=pl.Buffered(3) on the k/v specs
    # to better hide the banded re-fetch behind compute (lowest HBM bandwidth).
    out = pl.pallas_call(
        functools.partial(_attn_kernel, num_heads=num_heads, tq=tq,
                          seq_len=S, window_size=window_size, n_side=n_side,
                          scale=scale),
        out_shape=jax.ShapeDtypeStruct((B, S, E), jnp.float32),
        grid=(B, nq, n_kv),
        in_specs=[pl.BlockSpec((1, num_heads, tq, D),
                               lambda b, qi, t: (b, 0, qi, 0)),
                  pl.BlockSpec((1, num_heads, tq, D), _kv_map),
                  pl.BlockSpec((1, num_heads, tq, D), _kv_map),
                  pl.BlockSpec((1, num_heads, 1, D),
                               lambda b, qi, t: (b, 0, 0, 0))],
        out_specs=pl.BlockSpec((1, tq, E), lambda b, qi, t: (b, qi, 0)),
        scratch_shapes=[pltpu.VMEM((num_heads, tq, 1), jnp.float32),    # m
                        pltpu.VMEM((num_heads, tq, 1), jnp.float32),    # l
                        pltpu.VMEM((num_heads, tq, D), jnp.float32)],   # acc
        compiler_params=pltpu.CompilerParams(
            # B and nq are both 'parallel' so v7x's two TensorCores share work.
            dimension_semantics=("parallel", "parallel", "arbitrary"),
            vmem_limit_bytes=vmem_limit),
        cost_estimate=attn_cost,
    )(q4, k4, v4, vsum)
    return out


# ----------------------------------------------------------------------------
# Pure numpy replica of the PyTorch forward (verification only)
# ----------------------------------------------------------------------------
def _reference(x, params, num_heads, window_size):
    B, S, E = x.shape
    D = E // num_heads
    scale = D ** (-0.5)
    xn = np.array(x)
    q = xn @ np.array(params["wq"]).T + np.array(params["bq"])
    k = xn @ np.array(params["wk"]).T + np.array(params["bk"])
    v = xn @ np.array(params["wv"]).T + np.array(params["bv"])
    q4 = q.reshape(B, num_heads, S, D)
    k4 = k.reshape(B, num_heads, S, D)
    v4 = v.reshape(B, num_heads, S, D)
    scores = np.zeros((B, num_heads, S, S), dtype=np.float32)
    for i in range(S):
        s0, e0 = max(0, i - window_size), min(S, i + window_size)
        scores[:, :, i, s0:e0] = np.einsum(
            "bhd,bhjd->bhj", q4[:, :, i], k4[:, :, s0:e0])
    scores = scores * scale
    scores = scores - scores.max(-1, keepdims=True)
    e = np.exp(scores)
    probs = e / e.sum(-1, keepdims=True)
    out = np.einsum("bhij,bhjd->bhid", probs, v4)
    return out.transpose(0, 2, 1, 3).reshape(B, S, E)


if __name__ == "__main__":
    B, S, E, H, W = 2, 8, 32, 4, 2   # batch, seq, embed, heads, window_size

    key = jax.random.PRNGKey(0)
    kx, k1, k2, k3, k4, k5, k6 = jax.random.split(key, 7)
    x = jax.random.normal(kx, (B, S, E), dtype=jnp.float32)
    params = {
        "wq": jax.random.normal(k1, (E, E), dtype=jnp.float32) * 0.1,
        "bq": jax.random.normal(k2, (E,), dtype=jnp.float32) * 0.1,
        "wk": jax.random.normal(k3, (E, E), dtype=jnp.float32) * 0.1,
        "bk": jax.random.normal(k4, (E,), dtype=jnp.float32) * 0.1,
        "wv": jax.random.normal(k5, (E, E), dtype=jnp.float32) * 0.1,
        "bv": jax.random.normal(k6, (E,), dtype=jnp.float32) * 0.1,
    }

    out = jax.block_until_ready(local_attention(x, params, H, W))
    ref = _reference(x, params, H, W)
    # bf16 MXU operands and bf16 q/k/v intermediates dominate the error budget
    # (~1e-2 worst-case absolute at these magnitudes); softmax math is f32.
    np.testing.assert_allclose(np.array(out), ref, atol=2e-2, rtol=2e-2)
    print("KERNEL_OK")
</pallas_src>

<mosaic_0001>
module attributes {stable_mosaic.version = 11 : i64} {
  func.func @_qkv_proj_kernel(%arg0: i32, %arg1: i32, %arg2: i32, %arg3: memref<1x8x32xf32, #tpu.memory_space<vmem>>, %arg4: memref<32x96xbf16, #tpu.memory_space<vmem>>, %arg5: memref<1x96xf32, #tpu.memory_space<vmem>>, %arg6: memref<1x8x32xbf16, #tpu.memory_space<vmem>>, %arg7: memref<1x8x32xbf16, #tpu.memory_space<vmem>>, %arg8: memref<1x8x32xbf16, #tpu.memory_space<vmem>>, %arg9: memref<8x96xf32, #tpu.memory_space<vmem>>) attributes {dimension_semantics = [#tpu.dimension_semantics<parallel>, #tpu.dimension_semantics<parallel>, #tpu.dimension_semantics<arbitrary>], iteration_bounds = array<i64: 2, 1, 1>, scalar_prefetch = 0 : i64, scratch_operands = 1 : i64, tpu.core_type = #tpu.core_type<tc>, window_params = [{transform_indices = @transform_0, window_bounds = array<i64: 1, 8, 32>}, {transform_indices = @transform_1, window_bounds = array<i64: 32, 96>}, {pipeline_mode = #tpu.pipeline_mode<synchronous>, transform_indices = @transform_2, window_bounds = array<i64: 1, 96>}, {transform_indices = @transform_3, window_bounds = array<i64: 1, 8, 32>}, {transform_indices = @transform_4, window_bounds = array<i64: 1, 8, 32>}, {transform_indices = @transform_5, window_bounds = array<i64: 1, 8, 32>}]} {
    %c0_i32 = arith.constant 0 : i32
    %0 = arith.cmpi eq, %arg2, %c0_i32 : i32
    %1 = arith.extui %0 : i1 to i32
    %c0_i32_0 = arith.constant 0 : i32
    %2 = arith.cmpi ne, %1, %c0_i32_0 : i32
    scf.if %2 {
      %cst_11 = arith.constant 0.000000e+00 : f32
      %14 = vector.broadcast %cst_11 : f32 to vector<8x96xf32>
      %c0_12 = arith.constant 0 : index
      %c0_13 = arith.constant 0 : index
      %15 = vector.load %arg9[%c0_12, %c0_13] : memref<8x96xf32, #tpu.memory_space<vmem>>, vector<8x96xf32>
      tpu.vector_store %arg9[%c0_12, %c0_13], %14 {strides = array<i32>} : memref<8x96xf32, #tpu.memory_space<vmem>>, vector<8x96xf32>,
    } else {
    }
    %c0 = arith.constant 0 : index
    %c0_1 = arith.constant 0 : index
    %c0_2 = arith.constant 0 : index
    %3 = vector.load %arg3[%c0, %c0_1, %c0_2] : memref<1x8x32xf32, #tpu.memory_space<vmem>>, vector<1x8x32xf32>
    %4 = vector.shape_cast %3 : vector<1x8x32xf32> to vector<8x32xf32>
    %5 = arith.truncf %4 : vector<8x32xf32> to vector<8x32xbf16>
    %c0_3 = arith.constant 0 : index
    %c0_4 = arith.constant 0 : index
    %6 = vector.load %arg9[%c0_3, %c0_4] : memref<8x96xf32, #tpu.memory_space<vmem>>, vector<8x96xf32>
    %c0_5 = arith.constant 0 : index
    %c0_6 = arith.constant 0 : index
    %7 = vector.load %arg4[%c0_5, %c0_6] : memref<32x96xbf16, #tpu.memory_space<vmem>>, vector<32x96xbf16>
    %cst = arith.constant dense<0.000000e+00> : vector<8x96xf32>
    %8 = tpu.matmul %5, %7, %cst {dimension_numbers = #tpu.dot_dimension_numbers<[1], [0], [0], [1], [0, 0, 1, 1], [], []>} : vector<8x32xbf16>, vector<32x96xbf16>, vector<8x96xf32> -> vector<8x96xf32>
    %9 = arith.addf %6, %8 : vector<8x96xf32>
    %c0_7 = arith.constant 0 : index
    %c0_8 = arith.constant 0 : index
    %10 = vector.load %arg9[%c0_7, %c0_8] : memref<8x96xf32, #tpu.memory_space<vmem>>, vector<8x96xf32>
    tpu.vector_store %arg9[%c0_7, %c0_8], %9 {strides = array<i32>} : memref<8x96xf32, #tpu.memory_space<vmem>>, vector<8x96xf32>,
    %c0_i32_9 = arith.constant 0 : i32
    %11 = arith.cmpi eq, %arg2, %c0_i32_9 : i32
    %12 = arith.extui %11 : i1 to i32
    %c0_i32_10 = arith.constant 0 : i32
    %13 = arith.cmpi ne, %12, %c0_i32_10 : i32
    scf.if %13 {
      %c0_11 = arith.constant 0 : index
      %c0_12 = arith.constant 0 : index
      %14 = vector.load %arg9[%c0_11, %c0_12] : memref<8x96xf32, #tpu.memory_space<vmem>>, vector<8x96xf32>
      %c0_13 = arith.constant 0 : index
      %c0_14 = arith.constant 0 : index
      %15 = vector.load %arg5[%c0_13, %c0_14] : memref<1x96xf32, #tpu.memory_space<vmem>>, vector<1x96xf32>
      %16 = vector.broadcast %15 : vector<1x96xf32> to vector<8x96xf32>
      %17 = arith.addf %14, %16 : vector<8x96xf32>
      %18 = vector.extract_strided_slice %17 {offsets = [0, 0], sizes = [8, 32], strides = [1, 1]} : vector<8x96xf32> to vector<8x32xf32>
      %19 = arith.truncf %18 : vector<8x32xf32> to vector<8x32xbf16>
      %c0_15 = arith.constant 0 : index
      %c0_16 = arith.constant 0 : index
      %c0_17 = arith.constant 0 : index
      %20 = vector.load %arg6[%c0_15, %c0_16, %c0_17] : memref<1x8x32xbf16, #tpu.memory_space<vmem>>, vector<1x8x32xbf16>
      %21 = vector.shape_cast %20 : vector<1x8x32xbf16> to vector<8x32xbf16>
      %22 = vector.shape_cast %19 : vector<8x32xbf16> to vector<1x8x32xbf16>
      tpu.vector_store %arg6[%c0_15, %c0_16, %c0_17], %22 {strides = array<i32>} : memref<1x8x32xbf16, #tpu.memory_space<vmem>>, vector<1x8x32xbf16>,
      %23 = vector.extract_strided_slice %17 {offsets = [0, 32], sizes = [8, 32], strides = [1, 1]} : vector<8x96xf32> to vector<8x32xf32>
      %24 = arith.truncf %23 : vector<8x32xf32> to vector<8x32xbf16>
      %c0_18 = arith.constant 0 : index
      %c0_19 = arith.constant 0 : index
      %c0_20 = arith.constant 0 : index
      %25 = vector.load %arg7[%c0_18, %c0_19, %c0_20] : memref<1x8x32xbf16, #tpu.memory_space<vmem>>, vector<1x8x32xbf16>
      %26 = vector.shape_cast %25 : vector<1x8x32xbf16> to vector<8x32xbf16>
      %27 = vector.shape_cast %24 : vector<8x32xbf16> to vector<1x8x32xbf16>
      tpu.vector_store %arg7[%c0_18, %c0_19, %c0_20], %27 {strides = array<i32>} : memref<1x8x32xbf16, #tpu.memory_space<vmem>>, vector<1x8x32xbf16>,
      %28 = vector.extract_strided_slice %17 {offsets = [0, 64], sizes = [8, 32], strides = [1, 1]} : vector<8x96xf32> to vector<8x32xf32>
      %29 = arith.truncf %28 : vector<8x32xf32> to vector<8x32xbf16>
      %c0_21 = arith.constant 0 : index
      %c0_22 = arith.constant 0 : index
      %c0_23 = arith.constant 0 : index
      %30 = vector.load %arg8[%c0_21, %c0_22, %c0_23] : memref<1x8x32xbf16, #tpu.memory_space<vmem>>, vector<1x8x32xbf16>
      %31 = vector.shape_cast %30 : vector<1x8x32xbf16> to vector<8x32xbf16>
      %32 = vector.shape_cast %29 : vector<8x32xbf16> to vector<1x8x32xbf16>
      tpu.vector_store %arg8[%c0_21, %c0_22, %c0_23], %32 {strides = array<i32>} : memref<1x8x32xbf16, #tpu.memory_space<vmem>>, vector<1x8x32xbf16>,
    } else {
    }
    return
  }
  func.func @transform_0(%arg0: i32, %arg1: i32, %arg2: i32) -> (i32, i32, i32) {
    %c0_i32 = arith.constant 0 : i32
    return %arg0, %arg1, %arg2 : i32, i32, i32
  }
  func.func @transform_1(%arg0: i32, %arg1: i32, %arg2: i32) -> (i32, i32) {
    %c0_i32 = arith.constant 0 : i32
    %c0_i32_0 = arith.constant 0 : i32
    return %arg2, %c0_i32 : i32, i32
  }
  func.func @transform_2(%arg0: i32, %arg1: i32, %arg2: i32) -> (i32, i32) {
    %c0_i32 = arith.constant 0 : i32
    %c0_i32_0 = arith.constant 0 : i32
    %c0_i32_1 = arith.constant 0 : i32
    return %c0_i32, %c0_i32_0 : i32, i32
  }
  func.func @transform_3(%arg0: i32, %arg1: i32, %arg2: i32) -> (i32, i32, i32) {
    %c0_i32 = arith.constant 0 : i32
    %c0_i32_0 = arith.constant 0 : i32
    return %arg0, %arg1, %c0_i32 : i32, i32, i32
  }
  func.func @transform_4(%arg0: i32, %arg1: i32, %arg2: i32) -> (i32, i32, i32) {
    %c0_i32 = arith.constant 0 : i32
    %c0_i32_0 = arith.constant 0 : i32
    return %arg0, %arg1, %c0_i32 : i32, i32, i32
  }
  func.func @transform_5(%arg0: i32, %arg1: i32, %arg2: i32) -> (i32, i32, i32) {
    %c0_i32 = arith.constant 0 : i32
    %c0_i32_0 = arith.constant 0 : i32
    return %arg0, %arg1, %c0_i32 : i32, i32, i32
  }
}

</mosaic_0001>

<bundles_post_ra>
// kernel: tpu_custom_call.1
= control target key start
LH: loop header
LB: loop body
LE: loop exit
PB: predicated region body
PF: predicated region fallthrough
CT: control target
= control target key end

     0   :  { %11 = vsyncpa [#allocation4], 0  ;;  %s1301_s0 = inlined_call_operand.hbm [shape: f32[2,8,32], index: 0, kind: input, shape index: {}]   ;;  %s1302_s1 = inlined_call_operand.hbm [shape: bf16[32,96], index: 1, kind: input, shape index: {}]   ;;  %s1303_s2 = inlined_call_operand.vmem [shape: f32[1,96], index: 2, kind: input, shape index: {}]   ;;  %s1304_s3 = inlined_call_operand.hbm [shape: bf16[2,8,32], index: 3, kind: output, shape index: {0}]   ;;  %s1305_s4 = inlined_call_operand.hbm [shape: bf16[2,8,32], index: 4, kind: output, shape index: {1}]   ;;  %s1306_s5 = inlined_call_operand.hbm [shape: bf16[2,8,32], index: 5, kind: output, shape index: {2}]  }
   0x1   :  { %13 = vsyncpa [#allocation4 + $0x1], 0 }
   0x2   :  { %14 = vsyncpa [#allocation7], 0 }
   0x3   :  { %15 = vsyncpa [#allocation5], 0 }
   0x4   :  { %17 = vsyncpa [#allocation5 + $0x1], 0 }
   0x5   :  { %18 = vsyncpa [#allocation10], 0 }
   0x6   :  { %20 = vsyncpa [#allocation10 + $0x1], 0  ;;  %s1000_s18 = smov 0   ;;  %s1002_s19 = smov 0  }
   0x7   :  { %s1004_s20 = smov 0   ;;  %s1006_s21 = smov 0  }
   0x8   :  { %s1008_s22 = smov 0   ;;  %s1010_s23 = smov 0  }
   0x9 LB: > { %s1031_s24 = sadd.s32 4294967295, %s957_s23   ;;  %s1310_s25 = sadd.s32 4294967294, %s957_s23   ;;  %s957_s23 = sphi %s1010_s23, %s26_s23   ;;  %s953_s22 = sphi %s1008_s22, %s1330_s22   ;;  %s949_s21 = sphi %s1006_s21, %s1329_s21   ;;  %s945_s20 = sphi %s1004_s20, %s1328_s20   ;;  %s941_s19 = sphi %s1002_s19, %s1327_s19   ;;  %s937_s18 = sphi %s1000_s18, %s1326_s18  }
   0xa   : > { %p69_p0 = scmp.ne.s32.totalorder %s941_s19, %s937_s18  ;;  %p1307_p1 = scmp.eq.s32.totalorder %s1031_s24, 0 }
   0xb   : > { %p148_p3 = scmp.eq.s32.totalorder %s1310_s25, 1  ;;  %p626_p5 = scmp.ge.s32.totalorder %s957_s23, 1 }
   0xc   : > { %p1042_p4 = por %p1307_p1, %p69_p0  ;;  %p211_p7 = scmp.lt.s32.totalorder %s957_s23, 3 }
   0xd   : > { %p1047_p6 = por %p148_p3, %p69_p0  ;;  %s959_s29 = smov [#allocation6]  }
   0xe   : > { %s1311_s26 = scalar_select %p1042_p4, 1, 0 }
   0xf   : > { %s1312_s27 = scalar_select %p1047_p6, 1, 0 }
  0x10   : > { %p1052_p8 = pnand %p626_p5, %p211_p7  ;;  %s226_s30 = sshll.u32 %s959_s29, 4  ;;  %s227_s30 = int_to_ptr.vmem [resolvable:$true] %s226_s30 }
  0x11   : > { %s45_s7 = sadd.s32 1, %s953_s22  ;;  %s753_s10 = scalar_lea.hbm %s1302_s1, 256 }
  0x12   : > { %s1313_s28 = scalar_select %p1052_p8, 1, 0 }
  0x13   : > { %p674_p9 = pneg %p1052_p8  ;;  %p754_p12 = scmp.ne.s32.totalorder %s1302_s1, %s753_s10 }
  0x14   : > { %p760_p5 = scmp.lt.u32.totalorder %s753_s10, %s1302_s1 }
  0x15   : > { %p1061_p11 = pnand %p674_p9, %p1307_p1 }
  0x17   : > { %p755_p13 = pneg %p1061_p11 }
  0x19   : > { %p756_p0 = pnand %p755_p13, %p754_p12 }
  0x1b   : > { %p757_p3 = pneg %p756_p0 }
  0x1d   : > { %p762_p7 = pnand %p760_p5, %p757_p3 }
  0x1f   : > { %765 = shalt.err (!%p762_p7)
}
  0x20   : > { %s766_s15 = scalar_lea.vmem %s227_s30, 256  ;;  %p774_p2 = scmp.lt.s32.totalorder %s227_s30, %s227_s30 }
  0x21   : > { %p767_p9 = scmp.ne.s32.totalorder %s227_s30, %s766_s15  ;;  %p775_p6 = scmp.lt.s32.totalorder %s766_s15, %s766_s15 }
  0x23   : > { %p769_p10 = pnand %p767_p9, %p755_p13  ;;  %p776_p4 = por %p775_p6, %p774_p2 }
  0x25   : > { %p770_p1 = pneg %p769_p10 }
  0x27   : > { %p777_p8 = pnand %p776_p4, %p770_p1 }
  0x29   : > { %780 = shalt.err (!%p777_p8)
}
  0x2a   : > { %s960_s16 = smov 64   ;;  %s961_s17 = smov 4  }
  0x2b   : > { %677 = dma.hbm_to_vmem [thread:$0]  (!%p1061_p11), %s1302_s1, 256, %s227_s30, [#allocation7], %s960_s16, %s960_s16, %s961_s17  }
  0x2c   : > { %p47_p1 = scmp.ge.s32.totalorder %s45_s7, 2  ;;  %s56_s9 = sadd.s32 1, %s945_s20 }
  0x2d   : > { %p63_p2 = scmp.ne.s32.totalorder %s945_s20, %s941_s19  ;;  %p64_p4 = scmp.eq.s32.totalorder %s957_s23, 0 }
  0x2e   : > { %s1332_s7 = smov (%p47_p1, %s45_s7), 0  ;;  %p1316_p8 = scmp.eq.s32.totalorder %s1031_s24, 1 }
  0x2f   : > { %p1088_p6 = por %p64_p4, %p63_p2  ;;  %s49_s6 = ssub.s32 %s953_s22, %s1332_s7 }
  0x30   : > { %p1094_p10 = por %p1316_p8, %p63_p2  ;;  %p693_p12 = scmp.lt.s32.totalorder %s957_s23, 2 }
  0x31   : > { %p54_p11 = scmp.eq.s32.totalorder %s49_s6, 0  ;;  %s243_s30 = sand.u32 1, %s945_s20  }
  0x32   : > { %s629_s12 = sshll.u32 %s243_s30, 3  ;;  %s630_s14 = sshll.u32 %s953_s22, 7 }
  0x33   : > { %s1103_s13 = scalar_select %p54_p11, %s945_s20, %s56_s9  }
  0x34   : > { %s1109_s17 = scalar_lea.hbm %s1301_s0, %s630_s14  ;;  %s247_s29 = scalar_lea.vmem [#allocation3], %s629_s12 }
  0x35   : > { %s256_s8 = sshll.u32 %s247_s29, 4  ;;  %p1115_p13 = pnand %p693_p12, %p1088_p6  ;;  %s1111_s8 = int_to_ptr.vmem [resolvable:$true] %s256_s8 }
  0x36   : > { %s244_s9 = scalar_lea.sflag [#allocation4], %s243_s30  ;;  %s781_s25 = scalar_lea.hbm %s1109_s17, 128 }
  0x37   : > { %p782_p0 = scmp.ne.s32.totalorder %s1109_s17, %s781_s25  ;;  %p783_p3 = pneg %p1115_p13 }
  0x38   : > { %s786_s15 = scalar_lea.hbm %s1301_s0, 256  ;;  %p787_p9 = scmp.lt.u32.totalorder %s1109_s17, %s1301_s0 }
  0x39   : > { %p784_p5 = pnand %p783_p3, %p782_p0  ;;  %p788_p1 = scmp.lt.u32.totalorder %s786_s15, %s781_s25 }
  0x3a   : > { %p790_p4 = scmp.lt.u32.totalorder %s781_s25, %s1109_s17 }
  0x3b   : > { %p785_p7 = pneg %p784_p5  ;;  %p789_p2 = por %p788_p1, %p787_p9 }
  0x3d   : > { %p791_p6 = por %p790_p4, %p789_p2 }
  0x3f   : > { %p792_p8 = pnand %p791_p6, %p785_p7 }
  0x41   : > { %795 = shalt.err (!%p792_p8)
}
  0x42   : > { %s796_s30 = scalar_lea.vmem %s1111_s8, 128  ;;  %s962_s29 = smov [#allocation3]  }
  0x43   : > { %p797_p12 = scmp.ne.s32.totalorder %s1111_s8, %s796_s30  ;;  %s801_s12 = sshll.u32 %s962_s29, 4  ;;  %s802_s12 = int_to_ptr.vmem [resolvable:$false] %s801_s12 }
  0x44   : > { %s803_s14 = scalar_lea.vmem %s802_s12, 256  ;;  %p804_p5 = scmp.lt.s32.totalorder %s1111_s8, %s802_s12 }
  0x45   : > { %p799_p11 = pnand %p797_p12, %p783_p3  ;;  %p805_p9 = scmp.lt.s32.totalorder %s803_s14, %s796_s30 }
  0x47   : > { %p800_p0 = pneg %p799_p11  ;;  %p806_p1 = por %p805_p9, %p804_p5 }
  0x49   : > { %p807_p2 = pnand %p806_p1, %p800_p0 }
  0x4b   : > { %810 = shalt.err (!%p807_p2)
}
  0x4c   : > { %681 = dma.hbm_to_vmem [thread:$0]  (!%p1115_p13), %s1109_s17, 128, %s1111_s8, %s244_s9  }
  0x4d   : > { %p1319_p7 = scmp.ne.s32.totalorder %s1313_s28, 0 }
  0x4e   : > { %s1147_s25 = sand.u32 (!%p1319_p7), 1, %s941_s19   ;;  %p1320_p3 = scmp.ne.s32.totalorder (!%p1319_p7), %s1311_s26, 0 }
  0x4f   : > { %265 = sbr.rel (%p1319_p7) target bundleno = 477 (0x1dd), region = 32  ;;  %s632_s15 = sshll.u32 (!%p1319_p7), %s1147_s25, 3 }
  0x50   : > { %s268_s10 = scalar_lea.sflag (!%p1319_p7), [#allocation4], %s1147_s25  ;;  %s271_s16 = scalar_lea.vmem (!%p1319_p7), [#allocation3], %s632_s15 }
  0x56   : > { %920 = dma.done.wait (%p1320_p3), %s268_s10, 128  }
  0x57   : > { %922 = vsyncadd (%p1320_p3), %s268_s10, 4294967168  ;;  %p1321_p4 = scmp.eq.s32.totalorder %s1031_s24, 0 }
  0x59   : > { %924 = dma.done.wait (%p1321_p4), [#allocation7], 256   ;;  %p1322_p13 = pmov %p1321_p4 }
  0x5a   : > { %vm318_vm0 = vcmask 785408   ;;  %v963_v0 = vmov 0.0   ;;  %vm964_vm1 = vmmov 0   ;;  %v751_v1 = vld [vmem:[#allocation6] sm:$0xff]   ;;  %v752_v2 = vld [vmem:[#allocation6 + $0x8] sm:$0xff]   ;;  %v320_v3 = vld [vmem:[%s271_s16] sm:$0xff] }
  0x5b   : > { %926 = vsyncadd (%p1322_p13), [#allocation7], 4294967040  ;;  %319 = vst.msk [vmem:[#allocation2] sm:$0xff] %vm318_vm0, %v963_v0  ;;  %654 = vmatprep.subr.bf16.mxu0 %v963_v0  ;;  %658 = vmatprep.mubr.msk.bf16.mxu0 %vm964_vm1, %v963_v0  ;;  %v321_v4 = vpack.c.bf16 %v320_v3, %v320_v3  ;;  %vm339_vm2 = vcmask 261120   ;;  %s1162_s26 = sshll.u32 %s1147_s25, 2  ;;  %s1168_s8 = sshll.u32 %s949_s21, 6 }
  0x5c   : > { %655 = vmatpush3.bf16.msra.mxu0 %v751_v1  ;;  %v640_v11 = vld [vmem:[%s1303_s2] ss:$0 sm:$0xff]  ;;  %s297_s6 = scalar_lea.vmem [#allocation8], %s1162_s26  ;;  %vm399_vm3 = vcmask 257024   ;;  %s1175_s12 = scalar_lea.hbm %s1304_s3, %s1168_s8 }
  0x5d   : > { %656 = vmatprep.subr.bf16.mxu0 %v963_v0  ;;  %s437_s9 = sshll.u32 %s297_s6, 4  ;;  %s965_s14 = smov 96   ;;  %s1177_s9 = int_to_ptr.vmem [resolvable:$true] %s437_s9 }
  0x5e   : > { %s413_s21 = scalar_lea.sflag [#allocation5], %s1147_s25  ;;  %s811_s15 = scalar_lea.vmem %s1177_s9, 64 }
  0x5f   : > { %p812_p6 = scmp.ne.s32.totalorder %s1177_s9, %s811_s15  ;;  %s966_s10 = smov [#allocation8]  }
  0x60   : > { %657 = vmatpush3.bf16.msra.mxu0 %v752_v2  ;;  %s815_s16 = sshll.u32 %s966_s10, 4  ;;  %s816_s16 = int_to_ptr.vmem [resolvable:$false] %s815_s16 }
  0x61   : > { %p813_p8 = pnand %p812_p6, %p1094_p10  ;;  %s817_s28 = scalar_lea.vmem %s816_s16, 128 }
  0x62   : > { %v322_v5 = vld [vmem:[#allocation2] sm:$0xff]  ;;  %p818_p11 = scmp.lt.s32.totalorder %s1177_s9, %s816_s16  ;;  %p819_p0 = scmp.lt.s32.totalorder %s817_s28, %s811_s15 }
  0x63   : > { %659 = vmatmul.mubr.msk.bf16.vlgmr.msra.gmra.mrb[0].mxu0 %vm339_vm2, %v321_v4  ;;  %p814_p12 = pneg %p813_p8 }
  0x64   : > { %p820_p5 = por %p819_p0, %p818_p11 }
  0x66   : > { %p821_p9 = pnand %p820_p5, %p814_p12 }
 0x136   : > { %v377_v6 = vpop.f32.mrb[0].mxu0 }
 0x137   : > { %v383_v7 = vadd.f32 %v377_v6, %v322_v5  ;;  %v660_v8 = vpop.f32.mrb[1].mxu0 }
 0x138   : > { %v380_v9 = vpop.f32.mrb[2].mxu0 }
 0x139   : > { %385 = vst.msk [vmem:[#allocation2] sm:$0xff] %vm318_vm0, %v383_v7  ;;  %v661_v10 = vpop.f32.mrb[3].mxu0 }
 0x140   : > { %v389_v12 = vld [vmem:[#allocation2] sm:$0xff] }
 0x141   : > { %v397_v13 = vadd.f32 %v640_v11, %v389_v12 }
 0x143   : > { %v398_v14 = vpack.c.bf16 %v397_v13, %v397_v13 }
 0x145   : > { %404 = vrot.lane.b32.xlu0 %v398_v14, %s965_s14  ;;  %400 = vst.msk [vmem:[%s297_s6] sm:$0xf] %vm399_vm3, %v398_v14 }
 0x146   : > { %824 = shalt.err (!%p821_p9)
}
 0x147   : > { %s825_s25 = scalar_lea.hbm %s1175_s12, 64  ;;  %s829_s30 = scalar_lea.hbm %s1304_s3, 128 }
 0x148   : > { %p826_p1 = scmp.ne.s32.totalorder %s1175_s12, %s825_s25  ;;  %p830_p3 = scmp.lt.u32.totalorder %s1175_s12, %s1304_s3 }
 0x149   : > { %p831_p4 = scmp.lt.u32.totalorder %s829_s30, %s825_s25  ;;  %p833_p6 = scmp.lt.u32.totalorder %s825_s25, %s1175_s12 }
 0x14a   : > { %p827_p2 = pnand %p826_p1, %p1094_p10 }
 0x14b   : > { %p832_p13 = por %p831_p4, %p830_p3 }
 0x14c   : > { %p828_p7 = pneg %p827_p2 }
 0x14d   : > { %p834_p8 = por %p833_p6, %p832_p13 }
 0x14f   : > { %p835_p12 = pnand %p834_p8, %p828_p7 }
 0x151   : > { %838 = shalt.err (!%p835_p12)
}
 0x152   : > { %668 = dma.vmem_to_hbm [thread:$0]  (%p1094_p10), %s1177_s9, 64, %s1175_s12, %s413_s21  }
 0x153   : > { %s967_s15 = smov 64   ;;  %s417_s10 = sand.u32 1, %s1031_s24  }
 0x154   : > { %408 = vrot.lane.b32.xlu0 %v398_v14, %s967_s15  ;;  %s304_s16 = scalar_lea.vmem [#allocation9], %s1162_s26  ;;  %s1208_s6 = scalar_lea.hbm %s1305_s4, %s1168_s8 }
 0x155   : > { %s451_s28 = sshll.u32 %s304_s16, 4  ;;  %s311_s30 = scalar_lea.vmem [#allocation11], %s1162_s26  ;;  %s1210_s28 = int_to_ptr.vmem [resolvable:$true] %s451_s28 }
 0x156   : > { %s1215_s29 = sshll.u32 %s311_s30, 4  ;;  %s1218_s24 = scalar_lea.sflag [#allocation10], %s417_s10  ;;  %s1249_s29 = int_to_ptr.vmem [resolvable:$true] %s1215_s29 }
 0x157   : > { %s839_s9 = scalar_lea.vmem %s1210_s28, 64  ;;  %s968_s12 = smov [#allocation9]  }
 0x158   : > { %p840_p11 = scmp.ne.s32.totalorder %s1210_s28, %s839_s9  ;;  %s843_s21 = sshll.u32 %s968_s12, 4  ;;  %s844_s21 = int_to_ptr.vmem [resolvable:$false] %s843_s21 }
 0x159   : > { %s845_s14 = scalar_lea.vmem %s844_s21, 128  ;;  %p846_p9 = scmp.lt.s32.totalorder %s1210_s28, %s844_s21 }
 0x15a   : > { %p841_p0 = pnand %p840_p11, %p1094_p10  ;;  %p847_p1 = scmp.lt.s32.totalorder %s845_s14, %s839_s9 }
 0x15c   : > { %p842_p5 = pneg %p841_p0  ;;  %p848_p2 = por %p847_p1, %p846_p9 }
 0x15e   : > { %p849_p7 = pnand %p848_p2, %p842_p5 }
 0x1b7   : > { %v405_v15 = vpop.permute.xlu0 %404 }
 0x1b8   : > { %407 = vst.msk [vmem:[%s304_s16] sm:$0xf] %vm399_vm3, %v405_v15 }
 0x1b9   : > { %852 = shalt.err (!%p849_p7)
}
 0x1ba   : > { %s853_s15 = scalar_lea.hbm %s1208_s6, 64  ;;  %s857_s25 = scalar_lea.hbm %s1305_s4, 128 }
 0x1bb   : > { %p854_p3 = scmp.ne.s32.totalorder %s1208_s6, %s853_s15  ;;  %p858_p6 = scmp.lt.u32.totalorder %s1208_s6, %s1305_s4 }
 0x1bc   : > { %p859_p8 = scmp.lt.u32.totalorder %s857_s25, %s853_s15  ;;  %p861_p11 = scmp.lt.u32.totalorder %s853_s15, %s1208_s6 }
 0x1bd   : > { %p855_p4 = pnand %p854_p3, %p1094_p10 }
 0x1be   : > { %p860_p12 = por %p859_p8, %p858_p6 }
 0x1bf   : > { %p856_p13 = pneg %p855_p4 }
 0x1c0   : > { %p862_p0 = por %p861_p11, %p860_p12 }
 0x1c2   : > { %p863_p5 = pnand %p862_p0, %p856_p13 }
 0x1c4   : > { %866 = shalt.err (!%p863_p5)
}
 0x1c5   : > { %669 = dma.vmem_to_hbm [thread:$0]  (%p1094_p10), %s1210_s28, 64, %s1208_s6, %s1218_s24  }
 0x1c6   : > { %s1246_s14 = scalar_lea.hbm %s1306_s5, %s1168_s8  ;;  %v409_v16 = vpop.permute.xlu0 %408  ;;  %s867_s15 = scalar_lea.vmem %s1249_s29, 64 }
 0x1c7   : > { %411 = vst.msk [vmem:[%s311_s30] sm:$0xf] %vm399_vm3, %v409_v16  ;;  %p868_p9 = scmp.ne.s32.totalorder %s1249_s29, %s867_s15  ;;  %s969_s28 = smov [#allocation11]  }
 0x1c8   : > { %s871_s6 = sshll.u32 %s969_s28, 4  ;;  %s872_s6 = int_to_ptr.vmem [resolvable:$false] %s871_s6 }
 0x1c9   : > { %p869_p1 = pnand %p868_p9, %p1094_p10  ;;  %s873_s10 = scalar_lea.vmem %s872_s6, 128 }
 0x1ca   : > { %p874_p7 = scmp.lt.s32.totalorder %s1249_s29, %s872_s6  ;;  %p875_p3 = scmp.lt.s32.totalorder %s873_s10, %s867_s15 }
 0x1cb   : > { %p870_p2 = pneg %p869_p1 }
 0x1cc   : > { %p876_p4 = por %p875_p3, %p874_p7 }
 0x1ce   : > { %p877_p13 = pnand %p876_p4, %p870_p2 }
 0x1d0   : > { %880 = shalt.err (!%p877_p13)
}
 0x1d1   : > { %s881_s26 = scalar_lea.hbm %s1246_s14, 64  ;;  %s885_s16 = scalar_lea.hbm %s1306_s5, 128 }
 0x1d2   : > { %p882_p6 = scmp.ne.s32.totalorder %s1246_s14, %s881_s26  ;;  %p886_p11 = scmp.lt.u32.totalorder %s1246_s14, %s1306_s5 }
 0x1d3   : > { %p887_p0 = scmp.lt.u32.totalorder %s885_s16, %s881_s26  ;;  %p889_p9 = scmp.lt.u32.totalorder %s881_s26, %s1246_s14 }
 0x1d4   : > { %p883_p8 = pnand %p882_p6, %p1094_p10 }
 0x1d5   : > { %p888_p5 = por %p887_p0, %p886_p11 }
 0x1d6   : > { %p884_p12 = pneg %p883_p8 }
 0x1d7   : > { %p890_p1 = por %p889_p9, %p888_p5 }
 0x1d9   : > { %p891_p2 = pnand %p890_p1, %p884_p12 }
 0x1db   : > { %894 = shalt.err (!%p891_p2)
}
 0x1dc   : > { %670 = dma.vmem_to_hbm [thread:$0]  (%p1094_p10), %s1249_s29, 64, %s1246_s14, %s1218_s24  }
 0x1dd PF: > { %s477_s12 = sand.u32 1, %s937_s18   ;;  %p1323_p7 = scmp.ne.s32.totalorder %s1312_s27, 0 }
 0x1de   : > { %p1324_p3 = scmp.ge.s32.totalorder %s957_s23, 2  ;;  %s478_s9 = scalar_lea.sflag [#allocation5], %s477_s12 }
 0x1e0   : > { %p683_p4 = pnand %p1324_p3, %p1323_p7 }
 0x1e2   : > { %928 = dma.done.wait (!%p683_p4), %s478_s9, 64  }
 0x1e3   : > { %930 = vsyncadd (!%p683_p4), %s478_s9, 4294967232  ;;  %s1325_s21 = sadd.s32 4294967294, %s957_s23  }
 0x1e4   : > { %s486_s15 = sand.u32 1, %s1325_s21  }
 0x1e5   : > { %s487_s28 = scalar_lea.sflag [#allocation10], %s486_s15 }
 0x1e6   : > { %932 = dma.done.wait (!%p683_p4), %s487_s28, 128  }
 0x1e7   : > { %934 = vsyncadd (!%p683_p4), %s487_s28, 4294967168  ;;  %s26_s23 = sadd.s32 1, %s957_s23   ;;  %s1326_s18 = smov %s941_s19 }
 0x1e8   : > { %p23_p10 = scmp.ge.s32.totalorder %s26_s23, 4   ;;  %s1327_s19 = smov %s945_s20 }
 0x1e9   : > { %s1328_s20 = smov %s1103_s13  ;;  %s1329_s21 = smov %s953_s22 }
 0x1ea   : > { %s1330_s22 = smov %s1332_s7  ;;  %25 = sbr.rel (!%p23_p10) target bundleno = 9 (0x9), region = 122 }
 0x1f1   :  { %501 = vsyncpa [#allocation4], 1 }
 0x1f2   :  { %503 = vsyncpa [#allocation4 + $0x1], 1 }
 0x1f3   :  { %504 = vsyncpa [#allocation7], 1 }
 0x1f4   :  { %505 = vsyncpa [#allocation5], 1 }
 0x1f5   :  { %507 = vsyncpa [#allocation5 + $0x1], 1 }
 0x1f6   :  { %508 = vsyncpa [#allocation10], 1 }
 0x1f7   :  { %510 = vsyncpa [#allocation10 + $0x1], 1 }

</bundles_post_ra>
